<compile_context>
chip_gen: v7x
topology: tpu7x:2x2x1
jax: 0.10.0
libtpu: 0.0.40
codegen_flags: <defaults>
</compile_context>

<pallas_src>
import functools

import jax
import jax.numpy as jnp
import numpy as np
from jax.experimental import pallas as pl
from jax.experimental.pallas import tpu as pltpu

MXU_DTYPE = jnp.bfloat16        # MXU operand dtype; accumulation stays f32


# ----------------------------------------------------------------------------
# Device-derived VMEM budget (v5e/v6e: 128 MiB, v7x: 64 MiB per TensorCore)
# ----------------------------------------------------------------------------

def _vmem_capacity_bytes():
    try:
        cap = getattr(pltpu.get_tpu_info(), "vmem_capacity_bytes", None)
        if cap:
            return int(cap)
    except Exception:
        pass
    return 64 * 1024 * 1024     # conservative fallback (v7x per-TC physical VMEM)


_VMEM_CAP = _vmem_capacity_bytes()
_VMEM_LIMIT_BYTES = max(32 * 1024 * 1024, int(_VMEM_CAP * 0.75))
_TILE_BUDGET_BYTES = max(24 * 1024 * 1024, int(_VMEM_CAP * 0.55))


def _compiler_params(num_grid_axes):
    return pltpu.CompilerParams(
        dimension_semantics=("parallel",) * num_grid_axes,
        vmem_limit_bytes=_VMEM_LIMIT_BYTES)


def _pick_epilogue_rows(n, d, f, budget_bytes):
    # Rough per-step VMEM estimate for the fused epilogue kernel:
    #   resident bf16 weights Wo(D,D) + W1(D,F) + W2(F,D), double-buffered by the pipeline
    #   (their block index never changes; see Buffered(1) TODO above), plus the row-tiled
    #   attn(bf16)/residual(f32)/out(f32) blocks (double-buffered) and f32 hidden activations.
    weights = 4 * (d * d + 2 * d * f)                 # bf16 * 2 (double buffer)
    for tn in (1024, 512, 256, 128, 64, 32, 16, 8):   # 128-multiples preferred (MXU-aligned)
        per_tile = 28 * tn * d + 8 * tn * f           # row blocks (+slack) + hidden f32
        if weights + per_tile <= budget_bytes:
            return tn
    return 8


# ----------------------------------------------------------------------------
# Kernels
# ----------------------------------------------------------------------------

def _attn_kernel(x_ref, wqkv_ref, bqkv_ref, o_ref, acc_ref, *, num_heads, head_dim):
    # x: (1, S, D) f32 for one batch; wqkv: (D, 3D) bf16 (pre-transposed); bqkv: (1, 3D) f32.
    # 1/sqrt(head_dim) is already folded into Wq/bq, so scores are not rescaled here.
    d = num_heads * head_dim
    x = x_ref[0]                                                     # (S, D)
    qkv = jnp.dot(x.astype(MXU_DTYPE), wqkv_ref[...],
                  preferred_element_type=jnp.float32) + bqkv_ref[...]  # (S, 3D) f32

    for h in range(num_heads):                                       # unrolled; static slices
        q = qkv[:, h * head_dim:(h + 1) * head_dim]
        k = qkv[:, d + h * head_dim:d + (h + 1) * head_dim]
        v = qkv[:, 2 * d + h * head_dim:2 * d + (h + 1) * head_dim]
        # scores without materializing k.T (contract last dims of both operands)
        s = jax.lax.dot_general(q.astype(MXU_DTYPE), k.astype(MXU_DTYPE),
                                (((1,), (1,)), ((), ())),
                                preferred_element_type=jnp.float32)
        s = s - jnp.max(s, axis=-1, keepdims=True)
        p = jnp.exp(s)
        p = p * pl.reciprocal(jnp.sum(p, axis=-1, keepdims=True), approx=True)
        # write this head's output into the f32 VMEM accumulator at a static lane offset;
        # the (S,S) scores and (S,Dh) output die here instead of staying live for a concat.
        acc_ref[:, h * head_dim:(h + 1) * head_dim] = jnp.dot(
            p.astype(MXU_DTYPE), v.astype(MXU_DTYPE),
            preferred_element_type=jnp.float32)

    o_ref[0] = acc_ref[...].astype(o_ref.dtype)      # single lane-dense (S, D) store


def _epilogue_kernel(a_ref, x_ref, wo_ref, bo_ref, g1_ref, be1_ref,
                     w1_ref, bf1_ref, w2_ref, bf2_ref, g2_ref, be2_ref,
                     o_ref, *, eps):
    # out-projection + residual + LayerNorm1
    y = jnp.dot(a_ref[...], wo_ref[...], preferred_element_type=jnp.float32) + bo_ref[...]
    z = x_ref[...].astype(jnp.float32) + y
    mu = jnp.mean(z, axis=-1, keepdims=True)
    var = jnp.mean((z - mu) ** 2, axis=-1, keepdims=True)
    h = (z - mu) * jax.lax.rsqrt(var + eps) * g1_ref[...] + be1_ref[...]

    # FFN (linear -> relu -> linear) + residual + LayerNorm2
    t = jnp.dot(h.astype(MXU_DTYPE), w1_ref[...],
                preferred_element_type=jnp.float32) + bf1_ref[...]
    t = jnp.maximum(t, 0.0)
    y2 = jnp.dot(t.astype(MXU_DTYPE), w2_ref[...],
                 preferred_element_type=jnp.float32) + bf2_ref[...]
    z2 = h + y2
    mu2 = jnp.mean(z2, axis=-1, keepdims=True)
    var2 = jnp.mean((z2 - mu2) ** 2, axis=-1, keepdims=True)
    o_ref[...] = ((z2 - mu2) * jax.lax.rsqrt(var2 + eps) * g2_ref[...]
                  + be2_ref[...]).astype(o_ref.dtype)


# ----------------------------------------------------------------------------
# Pallas wrappers
# ----------------------------------------------------------------------------

def fused_qkv_attention(src, wqkv_t, bqkv, num_heads):
    b, s, d = src.shape
    head_dim = d // num_heads
    return pl.pallas_call(
        functools.partial(_attn_kernel, num_heads=num_heads, head_dim=head_dim),
        out_shape=jax.ShapeDtypeStruct((b, s, d), MXU_DTYPE),
        grid=(b,),
        in_specs=[
            pl.BlockSpec((1, s, d), lambda i: (i, 0, 0)),
            pl.BlockSpec((d, 3 * d), lambda i: (0, 0)),      # weight stays VMEM-resident
            pl.BlockSpec((1, 3 * d), lambda i: (0, 0)),
        ],
        out_specs=pl.BlockSpec((1, s, d), lambda i: (i, 0, 0)),
        scratch_shapes=[pltpu.VMEM((s, d), jnp.float32)],     # per-head accumulator
        compiler_params=_compiler_params(1),
    )(src, wqkv_t, bqkv)


def fused_epilogue(attn2d, x2d, p, block_rows, eps=1e-5):
    n, d = x2d.shape
    tn = min(block_rows, n)
    row_spec = pl.BlockSpec((tn, d), lambda i: (i, 0))
    const = lambda shape: pl.BlockSpec(shape, lambda i: (0, 0))
    return pl.pallas_call(
        functools.partial(_epilogue_kernel, eps=eps),
        out_shape=jax.ShapeDtypeStruct((n, d), jnp.float32),
        grid=(pl.cdiv(n, tn),),
        in_specs=[row_spec, row_spec,
                  const(p["wo_t"].shape), const(p["bo"].shape),
                  const(p["ln1_g"].shape), const(p["ln1_b"].shape),
                  const(p["w1_t"].shape), const(p["b1"].shape),
                  const(p["w2_t"].shape), const(p["b2"].shape),
                  const(p["ln2_g"].shape), const(p["ln2_b"].shape)],
        out_specs=pl.BlockSpec((tn, d), lambda i: (i, 0)),
        compiler_params=_compiler_params(1),
    )(attn2d, x2d, p["wo_t"], p["bo"], p["ln1_g"], p["ln1_b"],
      p["w1_t"], p["b1"], p["w2_t"], p["b2"], p["ln2_g"], p["ln2_b"])


# ----------------------------------------------------------------------------
# Parameters
# ----------------------------------------------------------------------------

def init_params(key, embed_dim, num_heads, feedforward_dim):
    ks = jax.random.split(key, 6)

    def lin(k, dout, din):
        bound = 1.0 / np.sqrt(din)
        kw, kb = jax.random.split(k)
        w = jax.random.uniform(kw, (dout, din), jnp.float32, -bound, bound)
        b = jax.random.uniform(kb, (dout,), jnp.float32, -bound, bound)
        return w, b

    params = {}
    params["wq"], params["bq"] = lin(ks[0], embed_dim, embed_dim)
    params["wk"], params["bk"] = lin(ks[1], embed_dim, embed_dim)
    params["wv"], params["bv"] = lin(ks[2], embed_dim, embed_dim)
    params["wo"], params["bo"] = lin(ks[3], embed_dim, embed_dim)
    params["w1"], params["b1"] = lin(ks[4], feedforward_dim, embed_dim)
    params["w2"], params["b2"] = lin(ks[5], embed_dim, feedforward_dim)
    params["ln1_g"] = jnp.ones((embed_dim,), jnp.float32)
    params["ln1_b"] = jnp.zeros((embed_dim,), jnp.float32)
    params["ln2_g"] = jnp.ones((embed_dim,), jnp.float32)
    params["ln2_b"] = jnp.zeros((embed_dim,), jnp.float32)
    return params


def prepare_params(params, num_heads):
    # One-time packing: concat Q/K/V weights, pre-transpose all weights to (Din, Dout)
    # (no in-kernel .T), fold 1/sqrt(head_dim) into Wq/bq, store weights in bf16.
    embed_dim = params["wq"].shape[0]
    head_dim = embed_dim // num_heads
    scale = 1.0 / float(np.sqrt(head_dim))
    wqkv = jnp.concatenate([params["wq"] * scale, params["wk"], params["wv"]], axis=0)
    bqkv = jnp.concatenate([params["bq"] * scale, params["bk"], params["bv"]])
    return {
        "wqkv_t": wqkv.T.astype(MXU_DTYPE),                  # (D, 3D)
        "bqkv": bqkv[None, :].astype(jnp.float32),           # (1, 3D)
        "wo_t": params["wo"].T.astype(MXU_DTYPE),            # (D, D)
        "bo": params["bo"][None, :].astype(jnp.float32),
        "w1_t": params["w1"].T.astype(MXU_DTYPE),            # (D, F)
        "b1": params["b1"][None, :].astype(jnp.float32),
        "w2_t": params["w2"].T.astype(MXU_DTYPE),            # (F, D)
        "b2": params["b2"][None, :].astype(jnp.float32),
        "ln1_g": params["ln1_g"][None, :].astype(jnp.float32),
        "ln1_b": params["ln1_b"][None, :].astype(jnp.float32),
        "ln2_g": params["ln2_g"][None, :].astype(jnp.float32),
        "ln2_b": params["ln2_b"][None, :].astype(jnp.float32),
    }


# ----------------------------------------------------------------------------
# TransformerEncoderLayer forward
# ----------------------------------------------------------------------------

@functools.partial(jax.jit, static_argnames=("num_heads",))
def transformer_encoder_layer(src, prepared, num_heads):
    # src: (B, S, D) float32
    B, S, D = src.shape
    F = prepared["w1_t"].shape[1]
    N = B * S

    # 1) fused QKV projection + multi-head attention (no (N, 3D) HBM intermediate;
    #    head split/merge stays in-kernel; output stored bf16, lane-dense).
    attn = fused_qkv_attention(src, prepared["wqkv_t"], prepared["bqkv"], num_heads)

    # 2) fused epilogue: out-proj + residual + LN1 + FFN + residual + LN2
    #    (dropout = identity; removes the (N, D) f32 "h" HBM round trip).
    block_rows = _pick_epilogue_rows(N, D, F, _TILE_BUDGET_BYTES)
    out = fused_epilogue(attn.reshape(N, D), src.reshape(N, D), prepared, block_rows)
    return out.reshape(B, S, D)


# ----------------------------------------------------------------------------
# Pure-JAX reference (f32) for a sanity check
# ----------------------------------------------------------------------------

def reference(src, params, num_heads):
    B, S, D = src.shape
    Dh = D // num_heads
    scale = 1.0 / np.sqrt(Dh)

    def lin(x, w, b):
        return x @ w.T + b

    def ln(x, g, b, eps=1e-5):
        mu = x.mean(-1, keepdims=True)
        var = ((x - mu) ** 2).mean(-1, keepdims=True)
        return (x - mu) / jnp.sqrt(var + eps) * g + b

    q = lin(src, params["wq"], params["bq"]).reshape(B, S, num_heads, Dh).transpose(0, 2, 1, 3)
    k = lin(src, params["wk"], params["bk"]).reshape(B, S, num_heads, Dh).transpose(0, 2, 1, 3)
    v = lin(src, params["wv"], params["bv"]).reshape(B, S, num_heads, Dh).transpose(0, 2, 1, 3)
    s = jnp.einsum("bhqd,bhkd->bhqk", q, k) * scale
    p = jax.nn.softmax(s, axis=-1)
    a = jnp.einsum("bhqk,bhkd->bhqd", p, v).transpose(0, 2, 1, 3).reshape(B, S, D)
    attn_out = lin(a, params["wo"], params["bo"])
    h = ln(src + attn_out, params["ln1_g"], params["ln1_b"])
    ff = lin(jax.nn.relu(lin(h, params["w1"], params["b1"])), params["w2"], params["b2"])
    return ln(h + ff, params["ln2_g"], params["ln2_b"])


# ----------------------------------------------------------------------------

if __name__ == "__main__":
    B, S, D, H, F = 2, 8, 32, 4, 64
    key = jax.random.PRNGKey(0)
    k_src, k_par = jax.random.split(key)
    src = jax.random.normal(k_src, (B, S, D), jnp.float32)
    params = init_params(k_par, D, H, F)
    prepared = prepare_params(params, H)

    out = jax.block_until_ready(transformer_encoder_layer(src, prepared, H))

    ref = jax.block_until_ready(reference(src, params, H))
    # bf16 MXU operands / approx reciprocal softmax -> compare to the f32 reference loosely.
    np.testing.assert_allclose(np.asarray(out), np.asarray(ref), rtol=5e-2, atol=5e-2)

    print("KERNEL_OK")
</pallas_src>

<mosaic_0001>
module attributes {stable_mosaic.version = 11 : i64} {
  func.func @_attn_kernel(%arg0: i32, %arg1: memref<1x8x32xf32, #tpu.memory_space<vmem>>, %arg2: memref<32x96xbf16, #tpu.memory_space<vmem>>, %arg3: memref<1x96xf32, #tpu.memory_space<vmem>>, %arg4: memref<1x8x32xbf16, #tpu.memory_space<vmem>>, %arg5: memref<8x32xf32, #tpu.memory_space<vmem>>) attributes {dimension_semantics = [#tpu.dimension_semantics<parallel>], iteration_bounds = array<i64: 2>, scalar_prefetch = 0 : i64, scratch_operands = 1 : i64, tpu.core_type = #tpu.core_type<tc>, window_params = [{transform_indices = @transform_0, window_bounds = array<i64: 1, 8, 32>}, {pipeline_mode = #tpu.pipeline_mode<synchronous>, transform_indices = @transform_1, window_bounds = array<i64: 32, 96>}, {pipeline_mode = #tpu.pipeline_mode<synchronous>, transform_indices = @transform_2, window_bounds = array<i64: 1, 96>}, {transform_indices = @transform_3, window_bounds = array<i64: 1, 8, 32>}]} {
    %c0 = arith.constant 0 : index
    %c0_0 = arith.constant 0 : index
    %c0_1 = arith.constant 0 : index
    %0 = vector.load %arg1[%c0, %c0_0, %c0_1] : memref<1x8x32xf32, #tpu.memory_space<vmem>>, vector<1x8x32xf32>
    %1 = vector.shape_cast %0 : vector<1x8x32xf32> to vector<8x32xf32>
    %2 = arith.truncf %1 : vector<8x32xf32> to vector<8x32xbf16>
    %c0_2 = arith.constant 0 : index
    %c0_3 = arith.constant 0 : index
    %3 = vector.load %arg2[%c0_2, %c0_3] : memref<32x96xbf16, #tpu.memory_space<vmem>>, vector<32x96xbf16>
    %cst = arith.constant dense<0.000000e+00> : vector<8x96xf32>
    %4 = tpu.matmul %2, %3, %cst {dimension_numbers = #tpu.dot_dimension_numbers<[1], [0], [0], [1], [0, 0, 1, 1], [], []>} : vector<8x32xbf16>, vector<32x96xbf16>, vector<8x96xf32> -> vector<8x96xf32>
    %c0_4 = arith.constant 0 : index
    %c0_5 = arith.constant 0 : index
    %5 = vector.load %arg3[%c0_4, %c0_5] : memref<1x96xf32, #tpu.memory_space<vmem>>, vector<1x96xf32>
    %6 = vector.broadcast %5 : vector<1x96xf32> to vector<8x96xf32>
    %7 = arith.addf %4, %6 : vector<8x96xf32>
    %8 = vector.extract_strided_slice %7 {offsets = [0, 0], sizes = [8, 8], strides = [1, 1]} : vector<8x96xf32> to vector<8x8xf32>
    %9 = vector.extract_strided_slice %7 {offsets = [0, 32], sizes = [8, 8], strides = [1, 1]} : vector<8x96xf32> to vector<8x8xf32>
    %10 = vector.extract_strided_slice %7 {offsets = [0, 64], sizes = [8, 8], strides = [1, 1]} : vector<8x96xf32> to vector<8x8xf32>
    %11 = arith.truncf %8 : vector<8x8xf32> to vector<8x8xbf16>
    %12 = arith.truncf %9 : vector<8x8xf32> to vector<8x8xbf16>
    %cst_6 = arith.constant dense<0.000000e+00> : vector<8x8xf32>
    %13 = tpu.matmul %11, %12, %cst_6 {dimension_numbers = #tpu.dot_dimension_numbers<[1], [1], [0], [0], [0, 0, 1, 0], [], []>} : vector<8x8xbf16>, vector<8x8xbf16>, vector<8x8xf32> -> vector<8x8xf32>
    %cst_7 = arith.constant dense<0xFF800000> : vector<8xf32>
    %14 = vector.multi_reduction <maximumf>, %13, %cst_7 [1] : vector<8x8xf32> to vector<8xf32>
    %15 = vector.shape_cast %14 : vector<8xf32> to vector<8x1xf32>
    %16 = vector.broadcast %15 : vector<8x1xf32> to vector<8x8xf32>
    %17 = arith.subf %13, %16 : vector<8x8xf32>
    %18 = math.exp %17 : vector<8x8xf32>
    %cst_8 = arith.constant dense<0.000000e+00> : vector<8xf32>
    %19 = vector.multi_reduction <add>, %18, %cst_8 [1] : vector<8x8xf32> to vector<8xf32>
    %20 = vector.shape_cast %19 : vector<8xf32> to vector<8x1xf32>
    %21 = tpu.reciprocal %20 {approx = true} : vector<8x1xf32> -> vector<8x1xf32>
    %22 = vector.broadcast %21 : vector<8x1xf32> to vector<8x8xf32>
    %23 = arith.mulf %18, %22 : vector<8x8xf32>
    %24 = arith.truncf %23 : vector<8x8xf32> to vector<8x8xbf16>
    %25 = arith.truncf %10 : vector<8x8xf32> to vector<8x8xbf16>
    %cst_9 = arith.constant dense<0.000000e+00> : vector<8x8xf32>
    %26 = tpu.matmul %24, %25, %cst_9 {dimension_numbers = #tpu.dot_dimension_numbers<[1], [0], [0], [1], [0, 0, 1, 1], [], []>} : vector<8x8xbf16>, vector<8x8xbf16>, vector<8x8xf32> -> vector<8x8xf32>
    %c0_10 = arith.constant 0 : index
    %c0_11 = arith.constant 0 : index
    %27 = vector.load %arg5[%c0_10, %c0_11] : memref<8x32xf32, #tpu.memory_space<vmem>>, vector<8x8xf32>
    tpu.vector_store %arg5[%c0_10, %c0_11], %26 {strides = array<i32>} : memref<8x32xf32, #tpu.memory_space<vmem>>, vector<8x8xf32>,
    %28 = vector.extract_strided_slice %7 {offsets = [0, 8], sizes = [8, 8], strides = [1, 1]} : vector<8x96xf32> to vector<8x8xf32>
    %29 = vector.extract_strided_slice %7 {offsets = [0, 40], sizes = [8, 8], strides = [1, 1]} : vector<8x96xf32> to vector<8x8xf32>
    %30 = vector.extract_strided_slice %7 {offsets = [0, 72], sizes = [8, 8], strides = [1, 1]} : vector<8x96xf32> to vector<8x8xf32>
    %31 = arith.truncf %28 : vector<8x8xf32> to vector<8x8xbf16>
    %32 = arith.truncf %29 : vector<8x8xf32> to vector<8x8xbf16>
    %cst_12 = arith.constant dense<0.000000e+00> : vector<8x8xf32>
    %33 = tpu.matmul %31, %32, %cst_12 {dimension_numbers = #tpu.dot_dimension_numbers<[1], [1], [0], [0], [0, 0, 1, 0], [], []>} : vector<8x8xbf16>, vector<8x8xbf16>, vector<8x8xf32> -> vector<8x8xf32>
    %cst_13 = arith.constant dense<0xFF800000> : vector<8xf32>
    %34 = vector.multi_reduction <maximumf>, %33, %cst_13 [1] : vector<8x8xf32> to vector<8xf32>
    %35 = vector.shape_cast %34 : vector<8xf32> to vector<8x1xf32>
    %36 = vector.broadcast %35 : vector<8x1xf32> to vector<8x8xf32>
    %37 = arith.subf %33, %36 : vector<8x8xf32>
    %38 = math.exp %37 : vector<8x8xf32>
    %cst_14 = arith.constant dense<0.000000e+00> : vector<8xf32>
    %39 = vector.multi_reduction <add>, %38, %cst_14 [1] : vector<8x8xf32> to vector<8xf32>
    %40 = vector.shape_cast %39 : vector<8xf32> to vector<8x1xf32>
    %41 = tpu.reciprocal %40 {approx = true} : vector<8x1xf32> -> vector<8x1xf32>
    %42 = vector.broadcast %41 : vector<8x1xf32> to vector<8x8xf32>
    %43 = arith.mulf %38, %42 : vector<8x8xf32>
    %44 = arith.truncf %43 : vector<8x8xf32> to vector<8x8xbf16>
    %45 = arith.truncf %30 : vector<8x8xf32> to vector<8x8xbf16>
    %cst_15 = arith.constant dense<0.000000e+00> : vector<8x8xf32>
    %46 = tpu.matmul %44, %45, %cst_15 {dimension_numbers = #tpu.dot_dimension_numbers<[1], [0], [0], [1], [0, 0, 1, 1], [], []>} : vector<8x8xbf16>, vector<8x8xbf16>, vector<8x8xf32> -> vector<8x8xf32>
    %c0_16 = arith.constant 0 : index
    %c8 = arith.constant 8 : index
    %47 = vector.load %arg5[%c0_16, %c8] : memref<8x32xf32, #tpu.memory_space<vmem>>, vector<8x8xf32>
    tpu.vector_store %arg5[%c0_16, %c8], %46 {strides = array<i32>} : memref<8x32xf32, #tpu.memory_space<vmem>>, vector<8x8xf32>,
    %48 = vector.extract_strided_slice %7 {offsets = [0, 16], sizes = [8, 8], strides = [1, 1]} : vector<8x96xf32> to vector<8x8xf32>
    %49 = vector.extract_strided_slice %7 {offsets = [0, 48], sizes = [8, 8], strides = [1, 1]} : vector<8x96xf32> to vector<8x8xf32>
    %50 = vector.extract_strided_slice %7 {offsets = [0, 80], sizes = [8, 8], strides = [1, 1]} : vector<8x96xf32> to vector<8x8xf32>
    %51 = arith.truncf %48 : vector<8x8xf32> to vector<8x8xbf16>
    %52 = arith.truncf %49 : vector<8x8xf32> to vector<8x8xbf16>
    %cst_17 = arith.constant dense<0.000000e+00> : vector<8x8xf32>
    %53 = tpu.matmul %51, %52, %cst_17 {dimension_numbers = #tpu.dot_dimension_numbers<[1], [1], [0], [0], [0, 0, 1, 0], [], []>} : vector<8x8xbf16>, vector<8x8xbf16>, vector<8x8xf32> -> vector<8x8xf32>
    %cst_18 = arith.constant dense<0xFF800000> : vector<8xf32>
    %54 = vector.multi_reduction <maximumf>, %53, %cst_18 [1] : vector<8x8xf32> to vector<8xf32>
    %55 = vector.shape_cast %54 : vector<8xf32> to vector<8x1xf32>
    %56 = vector.broadcast %55 : vector<8x1xf32> to vector<8x8xf32>
    %57 = arith.subf %53, %56 : vector<8x8xf32>
    %58 = math.exp %57 : vector<8x8xf32>
    %cst_19 = arith.constant dense<0.000000e+00> : vector<8xf32>
    %59 = vector.multi_reduction <add>, %58, %cst_19 [1] : vector<8x8xf32> to vector<8xf32>
    %60 = vector.shape_cast %59 : vector<8xf32> to vector<8x1xf32>
    %61 = tpu.reciprocal %60 {approx = true} : vector<8x1xf32> -> vector<8x1xf32>
    %62 = vector.broadcast %61 : vector<8x1xf32> to vector<8x8xf32>
    %63 = arith.mulf %58, %62 : vector<8x8xf32>
    %64 = arith.truncf %63 : vector<8x8xf32> to vector<8x8xbf16>
    %65 = arith.truncf %50 : vector<8x8xf32> to vector<8x8xbf16>
    %cst_20 = arith.constant dense<0.000000e+00> : vector<8x8xf32>
    %66 = tpu.matmul %64, %65, %cst_20 {dimension_numbers = #tpu.dot_dimension_numbers<[1], [0], [0], [1], [0, 0, 1, 1], [], []>} : vector<8x8xbf16>, vector<8x8xbf16>, vector<8x8xf32> -> vector<8x8xf32>
    %c0_21 = arith.constant 0 : index
    %c16 = arith.constant 16 : index
    %67 = vector.load %arg5[%c0_21, %c16] : memref<8x32xf32, #tpu.memory_space<vmem>>, vector<8x8xf32>
    tpu.vector_store %arg5[%c0_21, %c16], %66 {strides = array<i32>} : memref<8x32xf32, #tpu.memory_space<vmem>>, vector<8x8xf32>,
    %68 = vector.extract_strided_slice %7 {offsets = [0, 24], sizes = [8, 8], strides = [1, 1]} : vector<8x96xf32> to vector<8x8xf32>
    %69 = vector.extract_strided_slice %7 {offsets = [0, 56], sizes = [8, 8], strides = [1, 1]} : vector<8x96xf32> to vector<8x8xf32>
    %70 = vector.extract_strided_slice %7 {offsets = [0, 88], sizes = [8, 8], strides = [1, 1]} : vector<8x96xf32> to vector<8x8xf32>
    %71 = arith.truncf %68 : vector<8x8xf32> to vector<8x8xbf16>
    %72 = arith.truncf %69 : vector<8x8xf32> to vector<8x8xbf16>
    %cst_22 = arith.constant dense<0.000000e+00> : vector<8x8xf32>
    %73 = tpu.matmul %71, %72, %cst_22 {dimension_numbers = #tpu.dot_dimension_numbers<[1], [1], [0], [0], [0, 0, 1, 0], [], []>} : vector<8x8xbf16>, vector<8x8xbf16>, vector<8x8xf32> -> vector<8x8xf32>
    %cst_23 = arith.constant dense<0xFF800000> : vector<8xf32>
    %74 = vector.multi_reduction <maximumf>, %73, %cst_23 [1] : vector<8x8xf32> to vector<8xf32>
    %75 = vector.shape_cast %74 : vector<8xf32> to vector<8x1xf32>
    %76 = vector.broadcast %75 : vector<8x1xf32> to vector<8x8xf32>
    %77 = arith.subf %73, %76 : vector<8x8xf32>
    %78 = math.exp %77 : vector<8x8xf32>
    %cst_24 = arith.constant dense<0.000000e+00> : vector<8xf32>
    %79 = vector.multi_reduction <add>, %78, %cst_24 [1] : vector<8x8xf32> to vector<8xf32>
    %80 = vector.shape_cast %79 : vector<8xf32> to vector<8x1xf32>
    %81 = tpu.reciprocal %80 {approx = true} : vector<8x1xf32> -> vector<8x1xf32>
    %82 = vector.broadcast %81 : vector<8x1xf32> to vector<8x8xf32>
    %83 = arith.mulf %78, %82 : vector<8x8xf32>
    %84 = arith.truncf %83 : vector<8x8xf32> to vector<8x8xbf16>
    %85 = arith.truncf %70 : vector<8x8xf32> to vector<8x8xbf16>
    %cst_25 = arith.constant dense<0.000000e+00> : vector<8x8xf32>
    %86 = tpu.matmul %84, %85, %cst_25 {dimension_numbers = #tpu.dot_dimension_numbers<[1], [0], [0], [1], [0, 0, 1, 1], [], []>} : vector<8x8xbf16>, vector<8x8xbf16>, vector<8x8xf32> -> vector<8x8xf32>
    %c0_26 = arith.constant 0 : index
    %c24 = arith.constant 24 : index
    %87 = vector.load %arg5[%c0_26, %c24] : memref<8x32xf32, #tpu.memory_space<vmem>>, vector<8x8xf32>
    tpu.vector_store %arg5[%c0_26, %c24], %86 {strides = array<i32>} : memref<8x32xf32, #tpu.memory_space<vmem>>, vector<8x8xf32>,
    %c0_27 = arith.constant 0 : index
    %c0_28 = arith.constant 0 : index
    %88 = vector.load %arg5[%c0_27, %c0_28] : memref<8x32xf32, #tpu.memory_space<vmem>>, vector<8x32xf32>
    %89 = arith.truncf %88 : vector<8x32xf32> to vector<8x32xbf16>
    %c0_29 = arith.constant 0 : index
    %c0_30 = arith.constant 0 : index
    %c0_31 = arith.constant 0 : index
    %90 = vector.load %arg4[%c0_29, %c0_30, %c0_31] : memref<1x8x32xbf16, #tpu.memory_space<vmem>>, vector<1x8x32xbf16>
    %91 = vector.shape_cast %90 : vector<1x8x32xbf16> to vector<8x32xbf16>
    %92 = vector.shape_cast %89 : vector<8x32xbf16> to vector<1x8x32xbf16>
    tpu.vector_store %arg4[%c0_29, %c0_30, %c0_31], %92 {strides = array<i32>} : memref<1x8x32xbf16, #tpu.memory_space<vmem>>, vector<1x8x32xbf16>,
    return
  }
  func.func @transform_0(%arg0: i32) -> (i32, i32, i32) {
    %c0_i32 = arith.constant 0 : i32
    %c0_i32_0 = arith.constant 0 : i32
    %c0_i32_1 = arith.constant 0 : i32
    return %arg0, %c0_i32, %c0_i32_0 : i32, i32, i32
  }
  func.func @transform_1(%arg0: i32) -> (i32, i32) {
    %c0_i32 = arith.constant 0 : i32
    %c0_i32_0 = arith.constant 0 : i32
    %c0_i32_1 = arith.constant 0 : i32
    return %c0_i32, %c0_i32_0 : i32, i32
  }
  func.func @transform_2(%arg0: i32) -> (i32, i32) {
    %c0_i32 = arith.constant 0 : i32
    %c0_i32_0 = arith.constant 0 : i32
    %c0_i32_1 = arith.constant 0 : i32
    return %c0_i32, %c0_i32_0 : i32, i32
  }
  func.func @transform_3(%arg0: i32) -> (i32, i32, i32) {
    %c0_i32 = arith.constant 0 : i32
    %c0_i32_0 = arith.constant 0 : i32
    %c0_i32_1 = arith.constant 0 : i32
    return %arg0, %c0_i32, %c0_i32_0 : i32, i32, i32
  }
}

module attributes {stable_mosaic.version = 11 : i64} {
  func.func @_epilogue_kernel(%arg0: i32, %arg1: memref<16x32xbf16, #tpu.memory_space<vmem>>, %arg2: memref<16x32xf32, #tpu.memory_space<vmem>>, %arg3: memref<32x32xbf16, #tpu.memory_space<vmem>>, %arg4: memref<1x32xf32, #tpu.memory_space<vmem>>, %arg5: memref<1x32xf32, #tpu.memory_space<vmem>>, %arg6: memref<1x32xf32, #tpu.memory_space<vmem>>, %arg7: memref<32x64xbf16, #tpu.memory_space<vmem>>, %arg8: memref<1x64xf32, #tpu.memory_space<vmem>>, %arg9: memref<64x32xbf16, #tpu.memory_space<vmem>>, %arg10: memref<1x32xf32, #tpu.memory_space<vmem>>, %arg11: memref<1x32xf32, #tpu.memory_space<vmem>>, %arg12: memref<1x32xf32, #tpu.memory_space<vmem>>, %arg13: memref<16x32xf32, #tpu.memory_space<vmem>>) attributes {dimension_semantics = [#tpu.dimension_semantics<parallel>], iteration_bounds = array<i64: 1>, scalar_prefetch = 0 : i64, scratch_operands = 0 : i64, tpu.core_type = #tpu.core_type<tc>, window_params = [{transform_indices = @transform_0, window_bounds = array<i64: 16, 32>}, {transform_indices = @transform_1, window_bounds = array<i64: 16, 32>}, {pipeline_mode = #tpu.pipeline_mode<synchronous>, transform_indices = @transform_2, window_bounds = array<i64: 32, 32>}, {pipeline_mode = #tpu.pipeline_mode<synchronous>, transform_indices = @transform_3, window_bounds = array<i64: 1, 32>}, {pipeline_mode = #tpu.pipeline_mode<synchronous>, transform_indices = @transform_4, window_bounds = array<i64: 1, 32>}, {pipeline_mode = #tpu.pipeline_mode<synchronous>, transform_indices = @transform_5, window_bounds = array<i64: 1, 32>}, {pipeline_mode = #tpu.pipeline_mode<synchronous>, transform_indices = @transform_6, window_bounds = array<i64: 32, 64>}, {pipeline_mode = #tpu.pipeline_mode<synchronous>, transform_indices = @transform_7, window_bounds = array<i64: 1, 64>}, {pipeline_mode = #tpu.pipeline_mode<synchronous>, transform_indices = @transform_8, window_bounds = array<i64: 64, 32>}, {pipeline_mode = #tpu.pipeline_mode<synchronous>, transform_indices = @transform_9, window_bounds = array<i64: 1, 32>}, {pipeline_mode = #tpu.pipeline_mode<synchronous>, transform_indices = @transform_10, window_bounds = array<i64: 1, 32>}, {pipeline_mode = #tpu.pipeline_mode<synchronous>, transform_indices = @transform_11, window_bounds = array<i64: 1, 32>}, {transform_indices = @transform_12, window_bounds = array<i64: 16, 32>}]} {
    %c0 = arith.constant 0 : index
    %c0_0 = arith.constant 0 : index
    %0 = vector.load %arg1[%c0, %c0_0] : memref<16x32xbf16, #tpu.memory_space<vmem>>, vector<16x32xbf16>
    %c0_1 = arith.constant 0 : index
    %c0_2 = arith.constant 0 : index
    %1 = vector.load %arg3[%c0_1, %c0_2] : memref<32x32xbf16, #tpu.memory_space<vmem>>, vector<32x32xbf16>
    %cst = arith.constant dense<0.000000e+00> : vector<16x32xf32>
    %2 = tpu.matmul %0, %1, %cst {dimension_numbers = #tpu.dot_dimension_numbers<[1], [0], [0], [1], [0, 0, 1, 1], [], []>} : vector<16x32xbf16>, vector<32x32xbf16>, vector<16x32xf32> -> vector<16x32xf32>
    %c0_3 = arith.constant 0 : index
    %c0_4 = arith.constant 0 : index
    %3 = vector.load %arg4[%c0_3, %c0_4] : memref<1x32xf32, #tpu.memory_space<vmem>>, vector<1x32xf32>
    %4 = vector.broadcast %3 : vector<1x32xf32> to vector<16x32xf32>
    %5 = arith.addf %2, %4 : vector<16x32xf32>
    %c0_5 = arith.constant 0 : index
    %c0_6 = arith.constant 0 : index
    %6 = vector.load %arg2[%c0_5, %c0_6] : memref<16x32xf32, #tpu.memory_space<vmem>>, vector<16x32xf32>
    %7 = arith.addf %6, %5 : vector<16x32xf32>
    %cst_7 = arith.constant dense<0.000000e+00> : vector<16xf32>
    %8 = vector.multi_reduction <add>, %7, %cst_7 [1] : vector<16x32xf32> to vector<16xf32>
    %9 = vector.shape_cast %8 : vector<16xf32> to vector<16x1xf32>
    %cst_8 = arith.constant 3.200000e+01 : f32
    %10 = vector.broadcast %cst_8 : f32 to vector<16x1xf32>
    %11 = arith.divf %9, %10 : vector<16x1xf32>
    %12 = vector.broadcast %11 : vector<16x1xf32> to vector<16x32xf32>
    %13 = arith.subf %7, %12 : vector<16x32xf32>
    %14 = arith.mulf %13, %13 : vector<16x32xf32>
    %cst_9 = arith.constant dense<0.000000e+00> : vector<16xf32>
    %15 = vector.multi_reduction <add>, %14, %cst_9 [1] : vector<16x32xf32> to vector<16xf32>
    %16 = vector.shape_cast %15 : vector<16xf32> to vector<16x1xf32>
    %cst_10 = arith.constant 3.200000e+01 : f32
    %17 = vector.broadcast %cst_10 : f32 to vector<16x1xf32>
    %18 = arith.divf %16, %17 : vector<16x1xf32>
    %19 = vector.broadcast %11 : vector<16x1xf32> to vector<16x32xf32>
    %20 = arith.subf %7, %19 : vector<16x32xf32>
    %cst_11 = arith.constant 9.99999974E-6 : f32
    %21 = vector.broadcast %cst_11 : f32 to vector<16x1xf32>
    %22 = arith.addf %18, %21 : vector<16x1xf32>
    %23 = math.rsqrt %22 : vector<16x1xf32>
    %24 = vector.broadcast %23 : vector<16x1xf32> to vector<16x32xf32>
    %25 = arith.mulf %20, %24 : vector<16x32xf32>
    %c0_12 = arith.constant 0 : index
    %c0_13 = arith.constant 0 : index
    %26 = vector.load %arg5[%c0_12, %c0_13] : memref<1x32xf32, #tpu.memory_space<vmem>>, vector<1x32xf32>
    %27 = vector.broadcast %26 : vector<1x32xf32> to vector<16x32xf32>
    %28 = arith.mulf %25, %27 : vector<16x32xf32>
    %c0_14 = arith.constant 0 : index
    %c0_15 = arith.constant 0 : index
    %29 = vector.load %arg6[%c0_14, %c0_15] : memref<1x32xf32, #tpu.memory_space<vmem>>, vector<1x32xf32>
    %30 = vector.broadcast %29 : vector<1x32xf32> to vector<16x32xf32>
    %31 = arith.addf %28, %30 : vector<16x32xf32>
    %32 = arith.truncf %31 : vector<16x32xf32> to vector<16x32xbf16>
    %c0_16 = arith.constant 0 : index
    %c0_17 = arith.constant 0 : index
    %33 = vector.load %arg7[%c0_16, %c0_17] : memref<32x64xbf16, #tpu.memory_space<vmem>>, vector<32x64xbf16>
    %cst_18 = arith.constant dense<0.000000e+00> : vector<16x64xf32>
    %34 = tpu.matmul %32, %33, %cst_18 {dimension_numbers = #tpu.dot_dimension_numbers<[1], [0], [0], [1], [0, 0, 1, 1], [], []>} : vector<16x32xbf16>, vector<32x64xbf16>, vector<16x64xf32> -> vector<16x64xf32>
    %c0_19 = arith.constant 0 : index
    %c0_20 = arith.constant 0 : index
    %35 = vector.load %arg8[%c0_19, %c0_20] : memref<1x64xf32, #tpu.memory_space<vmem>>, vector<1x64xf32>
    %36 = vector.broadcast %35 : vector<1x64xf32> to vector<16x64xf32>
    %37 = arith.addf %34, %36 : vector<16x64xf32>
    %cst_21 = arith.constant 0.000000e+00 : f32
    %38 = vector.broadcast %cst_21 : f32 to vector<16x64xf32>
    %39 = arith.maximumf %37, %38 : vector<16x64xf32>
    %40 = arith.truncf %39 : vector<16x64xf32> to vector<16x64xbf16>
    %c0_22 = arith.constant 0 : index
    %c0_23 = arith.constant 0 : index
    %41 = vector.load %arg9[%c0_22, %c0_23] : memref<64x32xbf16, #tpu.memory_space<vmem>>, vector<64x32xbf16>
    %cst_24 = arith.constant dense<0.000000e+00> : vector<16x32xf32>
    %42 = tpu.matmul %40, %41, %cst_24 {dimension_numbers = #tpu.dot_dimension_numbers<[1], [0], [0], [1], [0, 0, 1, 1], [], []>} : vector<16x64xbf16>, vector<64x32xbf16>, vector<16x32xf32> -> vector<16x32xf32>
    %c0_25 = arith.constant 0 : index
    %c0_26 = arith.constant 0 : index
    %43 = vector.load %arg10[%c0_25, %c0_26] : memref<1x32xf32, #tpu.memory_space<vmem>>, vector<1x32xf32>
    %44 = vector.broadcast %43 : vector<1x32xf32> to vector<16x32xf32>
    %45 = arith.addf %42, %44 : vector<16x32xf32>
    %46 = arith.addf %31, %45 : vector<16x32xf32>
    %cst_27 = arith.constant dense<0.000000e+00> : vector<16xf32>
    %47 = vector.multi_reduction <add>, %46, %cst_27 [1] : vector<16x32xf32> to vector<16xf32>
    %48 = vector.shape_cast %47 : vector<16xf32> to vector<16x1xf32>
    %cst_28 = arith.constant 3.200000e+01 : f32
    %49 = vector.broadcast %cst_28 : f32 to vector<16x1xf32>
    %50 = arith.divf %48, %49 : vector<16x1xf32>
    %51 = vector.broadcast %50 : vector<16x1xf32> to vector<16x32xf32>
    %52 = arith.subf %46, %51 : vector<16x32xf32>
    %53 = arith.mulf %52, %52 : vector<16x32xf32>
    %cst_29 = arith.constant dense<0.000000e+00> : vector<16xf32>
    %54 = vector.multi_reduction <add>, %53, %cst_29 [1] : vector<16x32xf32> to vector<16xf32>
    %55 = vector.shape_cast %54 : vector<16xf32> to vector<16x1xf32>
    %cst_30 = arith.constant 3.200000e+01 : f32
    %56 = vector.broadcast %cst_30 : f32 to vector<16x1xf32>
    %57 = arith.divf %55, %56 : vector<16x1xf32>
    %58 = vector.broadcast %50 : vector<16x1xf32> to vector<16x32xf32>
    %59 = arith.subf %46, %58 : vector<16x32xf32>
    %cst_31 = arith.constant 9.99999974E-6 : f32
    %60 = vector.broadcast %cst_31 : f32 to vector<16x1xf32>
    %61 = arith.addf %57, %60 : vector<16x1xf32>
    %62 = math.rsqrt %61 : vector<16x1xf32>
    %63 = vector.broadcast %62 : vector<16x1xf32> to vector<16x32xf32>
    %64 = arith.mulf %59, %63 : vector<16x32xf32>
    %c0_32 = arith.constant 0 : index
    %c0_33 = arith.constant 0 : index
    %65 = vector.load %arg11[%c0_32, %c0_33] : memref<1x32xf32, #tpu.memory_space<vmem>>, vector<1x32xf32>
    %66 = vector.broadcast %65 : vector<1x32xf32> to vector<16x32xf32>
    %67 = arith.mulf %64, %66 : vector<16x32xf32>
    %c0_34 = arith.constant 0 : index
    %c0_35 = arith.constant 0 : index
    %68 = vector.load %arg12[%c0_34, %c0_35] : memref<1x32xf32, #tpu.memory_space<vmem>>, vector<1x32xf32>
    %69 = vector.broadcast %68 : vector<1x32xf32> to vector<16x32xf32>
    %70 = arith.addf %67, %69 : vector<16x32xf32>
    %c0_36 = arith.constant 0 : index
    %c0_37 = arith.constant 0 : index
    %71 = vector.load %arg13[%c0_36, %c0_37] : memref<16x32xf32, #tpu.memory_space<vmem>>, vector<16x32xf32>
    tpu.vector_store %arg13[%c0_36, %c0_37], %70 {strides = array<i32>} : memref<16x32xf32, #tpu.memory_space<vmem>>, vector<16x32xf32>,
    return
  }
  func.func @transform_0(%arg0: i32) -> (i32, i32) {
    %c0_i32 = arith.constant 0 : i32
    %c0_i32_0 = arith.constant 0 : i32
    return %arg0, %c0_i32 : i32, i32
  }
  func.func @transform_1(%arg0: i32) -> (i32, i32) {
    %c0_i32 = arith.constant 0 : i32
    %c0_i32_0 = arith.constant 0 : i32
    return %arg0, %c0_i32 : i32, i32
  }
  func.func @transform_2(%arg0: i32) -> (i32, i32) {
    %c0_i32 = arith.constant 0 : i32
    %c0_i32_0 = arith.constant 0 : i32
    %c0_i32_1 = arith.constant 0 : i32
    return %c0_i32, %c0_i32_0 : i32, i32
  }
  func.func @transform_3(%arg0: i32) -> (i32, i32) {
    %c0_i32 = arith.constant 0 : i32
    %c0_i32_0 = arith.constant 0 : i32
    %c0_i32_1 = arith.constant 0 : i32
    return %c0_i32, %c0_i32_0 : i32, i32
  }
  func.func @transform_4(%arg0: i32) -> (i32, i32) {
    %c0_i32 = arith.constant 0 : i32
    %c0_i32_0 = arith.constant 0 : i32
    %c0_i32_1 = arith.constant 0 : i32
    return %c0_i32, %c0_i32_0 : i32, i32
  }
  func.func @transform_5(%arg0: i32) -> (i32, i32) {
    %c0_i32 = arith.constant 0 : i32
    %c0_i32_0 = arith.constant 0 : i32
    %c0_i32_1 = arith.constant 0 : i32
    return %c0_i32, %c0_i32_0 : i32, i32
  }
  func.func @transform_6(%arg0: i32) -> (i32, i32) {
    %c0_i32 = arith.constant 0 : i32
    %c0_i32_0 = arith.constant 0 : i32
    %c0_i32_1 = arith.constant 0 : i32
    return %c0_i32, %c0_i32_0 : i32, i32
  }
  func.func @transform_7(%arg0: i32) -> (i32, i32) {
    %c0_i32 = arith.constant 0 : i32
    %c0_i32_0 = arith.constant 0 : i32
    %c0_i32_1 = arith.constant 0 : i32
    return %c0_i32, %c0_i32_0 : i32, i32
  }
  func.func @transform_8(%arg0: i32) -> (i32, i32) {
    %c0_i32 = arith.constant 0 : i32
    %c0_i32_0 = arith.constant 0 : i32
    %c0_i32_1 = arith.constant 0 : i32
    return %c0_i32, %c0_i32_0 : i32, i32
  }
  func.func @transform_9(%arg0: i32) -> (i32, i32) {
    %c0_i32 = arith.constant 0 : i32
    %c0_i32_0 = arith.constant 0 : i32
    %c0_i32_1 = arith.constant 0 : i32
    return %c0_i32, %c0_i32_0 : i32, i32
  }
  func.func @transform_10(%arg0: i32) -> (i32, i32) {
    %c0_i32 = arith.constant 0 : i32
    %c0_i32_0 = arith.constant 0 : i32
    %c0_i32_1 = arith.constant 0 : i32
    return %c0_i32, %c0_i32_0 : i32, i32
  }
  func.func @transform_11(%arg0: i32) -> (i32, i32) {
    %c0_i32 = arith.constant 0 : i32
    %c0_i32_0 = arith.constant 0 : i32
    %c0_i32_1 = arith.constant 0 : i32
    return %c0_i32, %c0_i32_0 : i32, i32
  }
  func.func @transform_12(%arg0: i32) -> (i32, i32) {
    %c0_i32 = arith.constant 0 : i32
    %c0_i32_0 = arith.constant 0 : i32
    return %arg0, %c0_i32 : i32, i32
  }
}

</mosaic_0001>

<bundles_post_ra>
// kernel: transformer_encoder_layer.3
= control target key start
LH: loop header
LB: loop body
LE: loop exit
PB: predicated region body
PF: predicated region fallthrough
CT: control target
= control target key end

     0   :  { %v490_v1 = vmov 0.0   ;;  %vm491_vm0 = vmmov 0   ;;  %vm73_vm1 = vcmask 261120   ;;  %s649_s0 = inlined_call_operand.vmem [shape: bf16[16,32], index: 0, kind: input, shape index: {}]   ;;  %s650_s1 = inlined_call_operand.vmem [shape: f32[16,32], index: 1, kind: input, shape index: {}]   ;;  %s651_s2 = inlined_call_operand.vmem [shape: bf16[32,32], index: 2, kind: input, shape index: {}]   ;;  %s652_s3 = inlined_call_operand.vmem [shape: f32[1,32], index: 3, kind: input, shape index: {}]   ;;  %s653_s4 = inlined_call_operand.vmem [shape: f32[1,32], index: 4, kind: input, shape index: {}]   ;;  %s654_s5 = inlined_call_operand.vmem [shape: f32[1,32], index: 5, kind: input, shape index: {}]   ;;  %s655_s6 = inlined_call_operand.vmem [shape: bf16[32,64], index: 6, kind: input, shape index: {}]   ;;  %s656_s7 = inlined_call_operand.vmem [shape: f32[1,64], index: 7, kind: input, shape index: {}]   ;;  %s657_s8 = inlined_call_operand.vmem [shape: bf16[64,32], index: 8, kind: input, shape index: {}]   ;;  %s658_s9 = inlined_call_operand.vmem [shape: f32[1,32], index: 9, kind: input, shape index: {}]   ;;  %s659_s10 = inlined_call_operand.vmem [shape: f32[1,32], index: 10, kind: input, shape index: {}]   ;;  %s660_s11 = inlined_call_operand.vmem [shape: f32[1,32], index: 11, kind: input, shape index: {}]   ;;  %s661_s12 = inlined_call_operand.hbm [shape: f32[16,32], index: 12, kind: output, shape index: {}]  }
   0x1   :  { %v449_v0 = vld [vmem:[%s651_s2] sm:$0xff]   ;;  %416 = vmatprep.subr.bf16.mxu1 %v490_v1  ;;  %432 = vmatprep.subr.bf16.mxu0 %v490_v1  ;;  %v450_v2 = vld [vmem:[%s651_s2 + $0x8] sm:$0xff]  }
   0x2   :  { %417 = vmatpush3.bf16.msra.mxu1 %v449_v0  ;;  %420 = vmatprep.mubr.msk.bf16.mxu1 %vm491_vm0, %v490_v1  ;;  %v451_v3 = vld [vmem:[%s649_s0] sm:$0xff]  }
   0x3   :  { %418 = vmatprep.subr.bf16.mxu1 %v490_v1  ;;  %440 = vmatprep.mubr.msk.bf16.mxu0 %vm491_vm0, %v490_v1 }
   0x6   :  { %419 = vmatpush3.bf16.msra.mxu1 %v450_v2 }
   0x7   :  { %424 = vmatprep.subr.bf16.mxu1 %v490_v1 }
   0x8   :  { %17 = vsyncpa [#allocation3], 0  ;;  %v386_v4 = vld [vmem:[%s652_s3] ss:$0 sm:$0xff]  ;;  %v119_v10 = vld [vmem:[%s650_s1 + $0x8] sm:$0xff]  ;;  %vm277_vm2 = vcmask 523264  }
   0x9   :  { %421 = vmatmul.mubr.msk.bf16.vlgmr.msra.gmra.mrb[0].mxu1 %vm73_vm1, %v451_v3  ;;  %v118_v6 = vld [vmem:[%s650_s1] sm:$0xff]  ;;  %v453_v28 = vld [vmem:[%s655_s6 + $0x8] sm:$0xff]   ;;  %v456_v48 = vld [vmem:[%s657_s8 + $0x10] sm:$0xff]   ;;  %s492_s28 = smov [#allocation2]  }
   0xa   :  { %428 = vmatprep.mubr.msk.bf16.mxu1 %vm491_vm0, %v490_v1  ;;  %v452_v27 = vld [vmem:[%s655_s6] sm:$0xff]   ;;  %v455_v30 = vld [vmem:[%s657_s8 + $0x8] sm:$0xff]   ;;  %v457_v49 = vld [vmem:[%s657_s8 + $0x18] sm:$0xff]   ;;  %s375_s29 = sshll.u32 %s492_s28, 4  ;;  %s376_s29 = int_to_ptr.vmem [resolvable:$true] %s375_s29 }
   0xb   :  { %425 = vmatpush3.bf16.msra.mxu1 %v452_v27  ;;  %v454_v29 = vld [vmem:[%s657_s8] sm:$0xff]   ;;  %s466_s0 = scalar_lea.vmem %s376_s29, 256  ;;  %p471_p1 = scmp.lt.s32.totalorder %s376_s29, %s376_s29 }
   0xc   :  { %426 = vmatprep.subr.bf16.mxu1 %v490_v1  ;;  %433 = vmatpush3.bf16.msra.mxu0 %v454_v29  ;;  %v391_v39 = vld [vmem:[%s653_s4] ss:$0 sm:$0xff]  ;;  %p467_p0 = scmp.ne.s32.totalorder %s376_s29, %s466_s0  ;;  %p472_p2 = scmp.lt.s32.totalorder %s466_s0, %s466_s0 }
   0xd   :  { %434 = vmatprep.subr.bf16.mxu0 %v490_v1  ;;  %v392_v43 = vld [vmem:[%s654_s5] ss:$0 sm:$0xff] }
   0xe   :  { %v393_v50 = vld [vmem:[%s656_s7] ss:$0 sm:$0xff]  ;;  %p473_p3 = por %p472_p2, %p471_p1 }
   0xf   :  { %427 = vmatpush3.bf16.msra.mxu1 %v453_v28  ;;  %v397_v60 = vld [vmem:[%s658_s9] ss:$0 sm:$0xff] }
  0x10   :  { %435 = vmatpush3.bf16.msra.mxu0 %v455_v30  ;;  %v404_v27 = vld [vmem:[%s660_s11] ss:$0 sm:$0xff]  ;;  %p474_p4 = pnand %p473_p3, %p467_p0 }
  0x11   :  { %436 = vmatprep.subr.bf16.mxu0 %v490_v1 }
  0x14   :  { %437 = vmatpush3.bf16.msra.mxu0 %v456_v48 }
  0x15   :  { %438 = vmatprep.subr.bf16.mxu0 %v490_v1 }
  0x18   :  { %439 = vmatpush3.bf16.msra.mxu0 %v457_v49 }
  0xdc   :  { %v111_v5 = vpop.f32.mrb[0].mxu1 }
  0xdd   :  { %v112_v7 = vadd.f32 %v386_v4, %v111_v5  ;;  %v422_v8 = vpop.f32.mrb[1].mxu1 }
  0xde   :  { %v114_v9 = vpop.f32.mrb[2].mxu1 }
  0xdf   :  { %v115_v11 = vadd.f32 %v386_v4, %v114_v9  ;;  %v423_v12 = vpop.f32.mrb[3].mxu1  ;;  %v120_v13 = vadd.f32 %v118_v6, %v112_v7 }
  0xe1   :  { %v122_v14 = vsel %vm73_vm1, %v120_v13, 0.0  ;;  %v121_v15 = vadd.f32 %v119_v10, %v115_v11 }
  0xe2   :  { %123 = vadd.xlane.f32.xlu0 %v122_v14 }
  0xe3   :  { %v125_v16 = vsel %vm73_vm1, %v121_v15, 0.0 }
  0xe6   :  { %126 = vadd.xlane.f32.xlu0 %v125_v16 }
 0x16f   :  { %v124_v17 = vpop.xlane.xlu0 %123 }
 0x170   :  { %v129_v18 = vmul.f32 0.03125, %v124_v17 }
 0x172   :  { %v131_v19 = vsub.f32 %v120_v13, %v129_v18 }
 0x173   :  { %v127_v20 = vpop.xlane.xlu0 %126 }
 0x174   :  { %v130_v21 = vmul.f32 0.03125, %v127_v20  ;;  %v133_v22 = vmul.f32 %v131_v19, %v131_v19 }
 0x176   :  { %v132_v23 = vsub.f32 %v121_v15, %v130_v21  ;;  %v135_v24 = vsel %vm73_vm1, %v133_v22, 0.0 }
 0x177   :  { %136 = vadd.xlane.f32.xlu1 %v135_v24  ;;  %v403_v24 = vld [vmem:[%s659_s10] ss:$0 sm:$0xff] }
 0x178   :  { %v134_v25 = vmul.f32 %v132_v23, %v132_v23 }
 0x17a   :  { %v138_v26 = vsel %vm73_vm1, %v134_v25, 0.0 }
 0x17b   :  { %139 = vadd.xlane.f32.xlu1 %v138_v26 }
 0x204   :  { %v137_v31 = vpop.xlane.xlu1 %136 }
 0x205   :  { %v141_v32 = vmul.f32 0.03125, %v137_v31 }
 0x207   :  { %v143_v33 = vadd.f32 1e-05, %v141_v32 }
 0x208   :  { %v140_v34 = vpop.xlane.xlu1 %139 }
 0x209   :  { %458 = vrsqrt.f32 %v143_v33  ;;  %v142_v35 = vmul.f32 0.03125, %v140_v34 }
 0x20b   :  { %v144_v36 = vadd.f32 1e-05, %v142_v35 }
 0x20d   :  { %460 = vrsqrt.f32 %v144_v36 }
 0x213   :  { %v459_v37 = vpop.eup %458 }
 0x214   :  { %v147_v38 = vmul.f32 %v459_v37, %v131_v19 }
 0x216   :  { %v156_v41 = vmul.f32 %v391_v39, %v147_v38 }
 0x217   :  { %v461_v40 = vpop.eup %460 }
 0x218   :  { %v148_v42 = vmul.f32 %v461_v40, %v132_v23  ;;  %v165_v45 = vadd.f32 %v392_v43, %v156_v41 }
 0x21a   :  { %v157_v44 = vmul.f32 %v391_v39, %v148_v42 }
 0x21c   :  { %v166_v46 = vadd.f32 %v392_v43, %v157_v44 }
 0x21e   :  { %v167_v47 = vpack.c.bf16 %v166_v46, %v165_v45 }
 0x220   :  { %429 = vmatmul.mubr.msk.bf16.vlgmr.msra.gmra.mrb[4].mxu1 %vm73_vm1, %v167_v47 }
 0x2f3   :  { %v228_v51 = vpop.f32.mrb[4].mxu1 }
 0x2f4   :  { %v229_v52 = vadd.f32 %v393_v50, %v228_v51  ;;  %v430_v53 = vpop.f32.mrb[5].mxu1 }
 0x2f5   :  { %v231_v54 = vpop.f32.mrb[6].mxu1 }
 0x2f6   :  { %v232_v55 = vadd.f32 %v393_v50, %v231_v54  ;;  %v431_v56 = vpop.f32.mrb[7].mxu1  ;;  %v235_v57 = vmax.f32 %v229_v52, 0.0 }
 0x2f8   :  { %v236_v58 = vmax.f32 %v232_v55, 0.0 }
 0x2fa   :  { %v237_v59 = vpack.c.bf16 %v236_v58, %v235_v57 }
 0x2fc   :  { %441 = vmatmul.mubr.msk.bf16.vlgmr.msra.gmra.mrb[0].mxu0 %vm277_vm2, %v237_v59 }
 0x3cf   :  { %v315_v61 = vpop.f32.mrb[0].mxu0 }
 0x3d0   :  { %v316_v62 = vadd.f32 %v397_v60, %v315_v61  ;;  %v442_v63 = vpop.f32.mrb[1].mxu0 }
 0x3d1   :  { %v318_v0 = vpop.f32.mrb[2].mxu0 }
 0x3d2   :  { %v319_v1 = vadd.f32 %v397_v60, %v318_v0  ;;  %v443_v2 = vpop.f32.mrb[3].mxu0  ;;  %v322_v3 = vadd.f32 %v316_v62, %v165_v45 }
 0x3d4   :  { %v324_v4 = vsel %vm73_vm1, %v322_v3, 0.0  ;;  %v323_v5 = vadd.f32 %v319_v1, %v166_v46 }
 0x3d5   :  { %325 = vadd.xlane.f32.xlu0 %v324_v4 }
 0x3d6   :  { %v327_v6 = vsel %vm73_vm1, %v323_v5, 0.0 }
 0x3d7   :  { %328 = vadd.xlane.f32.xlu1 %v327_v6 }
 0x462   :  { %v326_v7 = vpop.xlane.xlu0 %325 }
 0x463   :  { %v330_v8 = vmul.f32 0.03125, %v326_v7 }
 0x464   :  { %v329_v9 = vpop.xlane.xlu1 %328 }
 0x465   :  { %v332_v10 = vsub.f32 %v322_v3, %v330_v8  ;;  %v331_v11 = vmul.f32 0.03125, %v329_v9 }
 0x467   :  { %v333_v12 = vsub.f32 %v323_v5, %v331_v11  ;;  %v334_v13 = vmul.f32 %v332_v10, %v332_v10 }
 0x469   :  { %v336_v14 = vsel %vm73_vm1, %v334_v13, 0.0  ;;  %v335_v15 = vmul.f32 %v333_v12, %v333_v12 }
 0x46a   :  { %337 = vadd.xlane.f32.xlu0 %v336_v14 }
 0x46b   :  { %v339_v16 = vsel %vm73_vm1, %v335_v15, 0.0 }
 0x46c   :  { %340 = vadd.xlane.f32.xlu1 %v339_v16 }
 0x4f7   :  { %v338_v17 = vpop.xlane.xlu0 %337 }
 0x4f8   :  { %v342_v18 = vmul.f32 0.03125, %v338_v17 }
 0x4f9   :  { %v341_v19 = vpop.xlane.xlu1 %340 }
 0x4fa   :  { %v344_v20 = vadd.f32 1e-05, %v342_v18  ;;  %v343_v21 = vmul.f32 0.03125, %v341_v19 }
 0x4fc   :  { %462 = vrsqrt.f32 %v344_v20  ;;  %v345_v22 = vadd.f32 1e-05, %v343_v21 }
 0x4fe   :  { %464 = vrsqrt.f32 %v345_v22 }
 0x506   :  { %v463_v23 = vpop.eup %462 }
 0x507   :  { %v348_v25 = vmul.f32 %v463_v23, %v332_v10 }
 0x508   :  { %v465_v26 = vpop.eup %464 }
 0x509   :  { %v349_v28 = vmul.f32 %v465_v26, %v333_v12  ;;  %v357_v29 = vmul.f32 %v403_v24, %v348_v25 }
 0x50b   :  { %v358_v30 = vmul.f32 %v403_v24, %v349_v28  ;;  %v366_v31 = vadd.f32 %v404_v27, %v357_v29 }
 0x50d   :  { %v367_v32 = vadd.f32 %v404_v27, %v358_v30  ;;  %368 = vst.msk [vmem:[#allocation2] sm:$0xff] %vm73_vm1, %v366_v31 }
 0x50f   :  { %369 = vst.msk [vmem:[#allocation2 + $0x8] sm:$0xff] %vm73_vm1, %v367_v32 }
 0x510   :  { %477 = shalt.err (!%p474_p4)
}
 0x511   :  { %s478_s30 = scalar_lea.hbm %s661_s12, 256 }
 0x512   :  { %p479_p5 = scmp.ne.s32.totalorder %s661_s12, %s478_s30  ;;  %p482_p6 = scmp.lt.u32.totalorder %s478_s30, %s661_s12 }
 0x514   :  { %p484_p7 = pnand %p482_p6, %p479_p5 }
 0x516   :  { %487 = shalt.err (!%p484_p7)
}
 0x517   :  { %s493_s15 = smov 128   ;;  %s494_s16 = smov 8  }
 0x518   :  { %381 = dma.vmem_to_hbm [thread:$0]  %s376_s29, 256, %s661_s12, [#allocation3], %s493_s15, %s493_s15, %s494_s16  }
 0x519   :  { %488 = dma.done.wait [#allocation3], 256  }
 0x51a   :  { %489 = vsyncadd [#allocation3], 4294967040 }
 0x51b   :  { %385 = vsyncpa [#allocation3], 1 }

// kernel: transformer_encoder_layer.2
= control target key start
LH: loop header
LB: loop body
LE: loop exit
PB: predicated region body
PF: predicated region fallthrough
CT: control target
= control target key end

     0   :  { %s936_s12 = smov 0   ;;  %s1033_s0 = inlined_call_operand.vmem [shape: f32[2,8,32], index: 0, kind: input, shape index: {}]   ;;  %s1034_s1 = inlined_call_operand.vmem [shape: bf16[32,96], index: 1, kind: input, shape index: {}]   ;;  %s1035_s2 = inlined_call_operand.vmem [shape: f32[1,96], index: 2, kind: input, shape index: {}]   ;;  %s1036_s3 = inlined_call_operand.vmem [shape: bf16[2,8,32], index: 3, kind: output, shape index: {}]  }
   0x1 LB: > { %s754_s13 = sadd.s32 4294967295, %s898_s12   ;;  %p758_p0 = scmp.ge.s32.totalorder %s898_s12, 1  ;;  %s898_s12 = sphi %s936_s12, %s13_s12  }
   0x2   : > { %p136_p1 = scmp.lt.s32.totalorder %s898_s12, 3 }
   0x4   : > { %p137_p2 = pnand %p758_p0, %p136_p1 }
   0x5   : > { %v874_v0 = vld [vmem:[%s1034_s1] sm:$0xff] (!%p137_p2)   ;;  %v900_v1 = vmov (!%p137_p2), 0.0   ;;  %v875_v2 = vld [vmem:[%s1034_s1 + $0x8] sm:$0xff] (!%p137_p2)   ;;  %vm901_vm0 = vmmov (!%p137_p2), 0   ;;  %p158_p3 = scmp.lt.s32.totalorder (!%p137_p2), %s754_s13, 1  ;;  %vm192_vm1 = vcmask (!%p137_p2), 261120  }
   0x6   : > { %140 = sbr.rel (%p137_p2) target bundleno = 1286 (0x506), region = 32  ;;  %794 = vmatprep.subr.bf16.mxu0 (!%p137_p2), %v900_v1  ;;  %802 = vmatprep.subr.bf16.mxu1 (!%p137_p2), %v900_v1  ;;  %v761_v5 = vld [vmem:[%s1035_s2] ss:$0 sm:$0xff] (!%p137_p2)  ;;  %s902_s24 = smov (!%p137_p2), 120   ;;  %vm240_vm2 = vcmask (!%p137_p2), 64512   ;;  %vm304_vm3 = vcmask (!%p137_p2), 1043456  }
   0x7   : > { %795 = vmatpush3.bf16.msra.mxu0 (!%p137_p2), %v874_v0  ;;  %798 = vmatprep.mubr.msk.bf16.mxu0 (!%p137_p2), %vm901_vm0, %v900_v1  ;;  %s903_s25 = smov (!%p137_p2), 96   ;;  %s904_s26 = smov (!%p137_p2), 80   ;;  %vm463_vm4 = vcmask (!%p137_p2), 130112   ;;  %vm579_vm5 = vcmask (!%p137_p2), 195712   ;;  %vm695_vm6 = vcmask (!%p137_p2), 261312   ;;  %vm699_vm7 = vcmask (!%p137_p2), 257024  }
   0x8   : > { %796 = vmatprep.subr.bf16.mxu0 (!%p137_p2), %v900_v1  ;;  %804 = vmatprep.mubr.msk.bf16.mxu1 (!%p137_p2), %vm901_vm0, %v900_v1  ;;  %s905_s27 = smov (!%p137_p2), 88   ;;  %s906_s28 = smov (!%p137_p2), 72  }
   0x9   : > { %s907_s29 = smov (!%p137_p2), 112   ;;  %s908_s30 = smov (!%p137_p2), 104  }
   0xa   : > { %s909_s4 = smov (!%p137_p2), 56   ;;  %s910_s5 = smov (!%p137_p2), 64  }
   0xb   : > { %797 = vmatpush3.bf16.msra.mxu0 (!%p137_p2), %v875_v2  ;;  %s911_s6 = smov (!%p137_p2), 40   ;;  %s912_s7 = smov (!%p137_p2), 48  }
   0xc   : > { %808 = vmatprep.subr.bf16.mxu0 (!%p137_p2), %v900_v1  ;;  %s913_s8 = smov (!%p137_p2), 8   ;;  %s914_s9 = smov (!%p137_p2), 16  }
   0xd   : > { %s1038_s13 = smov (!%p158_p3, %s754_s13), 1  ;;  %s915_s10 = smov 24  }
   0xe   : > { %s759_s18 = sshll.u32 %s1038_s13, 3  ;;  %s760_s11 = sshll.u32 %s1038_s13, 2 }
   0xf   : > { %s161_s21 = scalar_lea.vmem %s1033_s0, %s759_s18  ;;  %s165_s16 = scalar_lea.vmem %s1036_s3, %s760_s11 }
  0x10   : > { %v167_v3 = vld [vmem:[%s161_s21] sm:$0xff] }
  0x11   : > { %v168_v4 = vpack.c.bf16 %v167_v3, %v167_v3 }
  0x13   : > { %799 = vmatmul.mubr.msk.bf16.vlgmr.msra.gmra.mrb[0].mxu0 %vm192_vm1, %v168_v4 }
  0x14   : > { %810 = vmatprep.mubr.msk.bf16.mxu0 %vm901_vm0, %v900_v1 }
  0xe6   : > { %v230_v6 = vpop.f32.mrb[0].mxu0 }
  0xe7   : > { %v231_v7 = vadd.f32 %v761_v5, %v230_v6  ;;  %v800_v8 = vpop.f32.mrb[1].mxu0 }
  0xe8   : > { %v233_v9 = vpop.f32.mrb[2].mxu0 }
  0xe9   : > { %v969_v10 = vpack.c.bf16 %v231_v7, %v231_v7  ;;  %v801_v11 = vpop.f32.mrb[3].mxu0 }
  0xeb   : > { %349 = vrot.lane.b32.xlu1 %v969_v10, %s902_s24  ;;  %238 = vrot.lane.b32.xlu0 %v969_v10, %s903_s25 }
  0xef   : > { %467 = vrot.lane.b32.xlu1 %v969_v10, %s904_s26  ;;  %351 = vrot.lane.b32.xlu0 %v969_v10, %s905_s27 }
  0xf3   : > { %583 = vrot.lane.b32.xlu1 %v969_v10, %s906_s28  ;;  %465 = vrot.lane.b32.xlu0 %v969_v10, %s907_s29 }
  0xf7   : > { %581 = vrot.lane.b32.xlu0 %v969_v10, %s908_s30 }
 0x15d   : > { %v239_v12 = vpop.permute.xlu0 %238  ;;  %v350_v15 = vpop.permute.xlu1 %349 }
 0x15e   : > { %v245_v13 = vsel %vm240_vm2, %v239_v12, 0 }
 0x15f   : > { %803 = vmatpush3.bf16.xpose.msra.mxu1 %v245_v13 }
 0x160   : > { %814 = vmatprep.subr.bf16.mxu1 %v900_v1 }
 0x161   : > { %v352_v14 = vpop.permute.xlu0 %351  ;;  %v468_v17 = vpop.permute.xlu1 %467 }
 0x162   : > { %v357_v16 = vsel %vm240_vm2, %v352_v14, 0  ;;  %v473_v18 = vsel %vm240_vm2, %v468_v17, 0 }
 0x165   : > { %v584_v19 = vpop.permute.xlu1 %583  ;;  %v466_v20 = vpop.permute.xlu0 %465 }
 0x166   : > { %805 = vmatmul.mubr.msk.bf16.vlgmr.msra.gmra.mrb[0].mxu1 %vm240_vm2, %v969_v10  ;;  %v589_v21 = vsel %vm240_vm2, %v584_v19, 0 }
 0x167   : > { %815 = vmatpush3.bf16.xpose.msra.mxu1 %v357_v16  ;;  %816 = vmatprep.mubr.msk.bf16.mxu1 %vm901_vm0, %v900_v1 }
 0x168   : > { %826 = vmatprep.subr.bf16.mxu1 %v900_v1 }
 0x169   : > { %v582_v22 = vpop.permute.xlu0 %581 }
 0x16e   : > { %817 = vmatmul.mubr.msk.bf16.vlgmr.msra.gmra.mrb[4].mxu1 %vm240_vm2, %v350_v15 }
 0x16f   : > { %827 = vmatpush3.bf16.xpose.msra.mxu1 %v473_v18  ;;  %828 = vmatprep.mubr.msk.bf16.mxu1 %vm901_vm0, %v900_v1 }
 0x170   : > { %838 = vmatprep.subr.bf16.mxu1 %v900_v1 }
 0x176   : > { %829 = vmatmul.mubr.msk.bf16.vlgmr.msra.gmra.mrb[8].mxu1 %vm240_vm2, %v466_v20 }
 0x177   : > { %839 = vmatpush3.bf16.xpose.msra.mxu1 %v589_v21  ;;  %840 = vmatprep.mubr.msk.bf16.mxu1 %vm901_vm0, %v900_v1 }
 0x17e   : > { %841 = vmatmul.mubr.msk.bf16.vlgmr.msra.gmra.mrb[12].mxu1 %vm240_vm2, %v582_v22 }
 0x239   : > { %v281_v23 = vpop.f32.mrb[0].mxu1 }
 0x23a   : > { %v806_v24 = vpop.f32.mrb[1].mxu1  ;;  %v287_v25 = vsel %vm240_vm2, %v281_v23, -inf }
 0x23b   : > { %288 = vmax.xlane.f32.xlu1 %v287_v25  ;;  %v284_v26 = vpop.f32.mrb[2].mxu1 }
 0x23c   : > { %v807_v27 = vpop.f32.mrb[3].mxu1 }
 0x241   : > { %v393_v28 = vpop.f32.mrb[4].mxu1 }
 0x242   : > { %v818_v29 = vpop.f32.mrb[5].mxu1  ;;  %v399_v30 = vsel %vm240_vm2, %v393_v28, -inf }
 0x243   : > { %400 = vmax.xlane.f32.xlu0 %v399_v30  ;;  %v396_v31 = vpop.f32.mrb[6].mxu1 }
 0x244   : > { %v819_v32 = vpop.f32.mrb[7].mxu1 }
 0x249   : > { %v509_v33 = vpop.f32.mrb[8].mxu1 }
 0x24a   : > { %v830_v34 = vpop.f32.mrb[9].mxu1  ;;  %v515_v35 = vsel %vm240_vm2, %v509_v33, -inf }
 0x24b   : > { %516 = vmax.xlane.f32.xlu0 %v515_v35  ;;  %v512_v36 = vpop.f32.mrb[10].mxu1 }
 0x24c   : > { %v831_v37 = vpop.f32.mrb[11].mxu1 }
 0x251   : > { %v625_v38 = vpop.f32.mrb[12].mxu1 }
 0x252   : > { %v842_v39 = vpop.f32.mrb[13].mxu1  ;;  %v631_v40 = vsel %vm240_vm2, %v625_v38, -inf }
 0x253   : > { %632 = vmax.xlane.f32.xlu1 %v631_v40  ;;  %v628_v41 = vpop.f32.mrb[14].mxu1 }
 0x254   : > { %v843_v42 = vpop.f32.mrb[15].mxu1 }
 0x2c8   : > { %v289_v43 = vpop.xlane.xlu1 %288 }
 0x2c9   : > { %v290_v44 = vsub.f32 %v281_v23, %v289_v43 }
 0x2cb   : > { %v291_v45 = vmul.f32 1.442695, %v290_v44 }
 0x2cd   : > { %876 = vpow2.f32 %v291_v45 }
 0x2d0   : > { %v401_v46 = vpop.xlane.xlu0 %400 }
 0x2d1   : > { %v402_v47 = vsub.f32 %v393_v28, %v401_v46 }
 0x2d3   : > { %v403_v48 = vmul.f32 1.442695, %v402_v47 }
 0x2d5   : > { %878 = vpow2.f32 %v403_v48 }
 0x2d7   : > { %v877_v49 = vpop.eup %876 }
 0x2d8   : > { %v517_v50 = vpop.xlane.xlu0 %516  ;;  %v293_v51 = vsel %vm240_vm2, %v877_v49, 0.0 }
 0x2d9   : > { %v518_v52 = vsub.f32 %v509_v33, %v517_v50  ;;  %294 = vadd.xlane.f32.xlu0 %v293_v51 }
 0x2db   : > { %v519_v53 = vmul.f32 1.442695, %v518_v52 }
 0x2dd   : > { %880 = vpow2.f32 %v519_v53 }
 0x2df   : > { %v879_v54 = vpop.eup %878 }
 0x2e0   : > { %v405_v55 = vsel %vm240_vm2, %v879_v54, 0.0  ;;  %v633_v58 = vpop.xlane.xlu1 %632 }
 0x2e1   : > { %406 = vadd.xlane.f32.xlu1 %v405_v55  ;;  %v634_v59 = vsub.f32 %v625_v38, %v633_v58 }
 0x2e3   : > { %v635_v60 = vmul.f32 1.442695, %v634_v59 }
 0x2e5   : > { %882 = vpow2.f32 %v635_v60 }
 0x2e7   : > { %v881_v56 = vpop.eup %880 }
 0x2e8   : > { %v521_v57 = vsel %vm240_vm2, %v881_v56, 0.0 }
 0x2e9   : > { %522 = vadd.xlane.f32.xlu0 %v521_v57 }
 0x2ef   : > { %v883_v61 = vpop.eup %882 }
 0x2f0   : > { %v637_v62 = vsel %vm240_vm2, %v883_v61, 0.0 }
 0x2f2   : > { %411 = vrot.lane.b32.xlu1 %v969_v10, %s909_s4 }
 0x2ff   : > { %299 = vrot.lane.b32.xlu0 %v969_v10, %s910_s5 }
 0x303   : > { %643 = vrot.lane.b32.xlu0 %v969_v10, %s911_s6 }
 0x316   : > { %638 = vadd.xlane.f32.xlu1 %v637_v62 }
 0x327   : > { %527 = vrot.lane.b32.xlu1 %v969_v10, %s912_s7 }
 0x366   : > { %v295_v63 = vpop.xlane.xlu0 %294 }
 0x367   : > { %884 = vrcp.f32 %v295_v63 }
 0x36e   : > { %v407_v0 = vpop.xlane.xlu1 %406 }
 0x36f   : > { %886 = vrcp.f32 %v407_v0 }
 0x371   : > { %v885_v2 = vpop.eup %884 }
 0x372   : > { %v297_v4 = vmul.f32 %v885_v2, %v877_v49  ;;  %v412_v7 = vpop.permute.xlu1 %411 }
 0x373   : > { %v417_v11 = vsel %vm304_vm3, %v412_v7, 0 }
 0x374   : > { %v298_v8 = vpack.c.bf16 %v297_v4, %v297_v4 }
 0x376   : > { %v523_v3 = vpop.xlane.xlu0 %522 }
 0x377   : > { %888 = vrcp.f32 %v523_v3 }
 0x379   : > { %v887_v9 = vpop.eup %886 }
 0x37a   : > { %v300_v5 = vpop.permute.xlu0 %299  ;;  %v409_v10 = vmul.f32 %v887_v9, %v879_v54 }
 0x37b   : > { %v306_v6 = vsel %vm304_vm3, %v300_v5, 0 }
 0x37c   : > { %809 = vmatpush3.bf16.msra.mxu0 %v306_v6  ;;  %v410_v12 = vpack.c.bf16 %v409_v10, %v409_v10 }
 0x37d   : > { %820 = vmatprep.subr.bf16.mxu0 %v900_v1 }
 0x37e   : > { %v644_v18 = vpop.permute.xlu0 %643 }
 0x37f   : > { %811 = vmatmul.mubr.msk.bf16.vlgmr.msra.gmra.mrb[4].mxu0 %vm240_vm2, %v298_v8  ;;  %v649_v20 = vsel %vm304_vm3, %v644_v18, 0 }
 0x380   : > { %821 = vmatpush3.bf16.msra.mxu0 %v417_v11  ;;  %822 = vmatprep.mubr.msk.bf16.mxu0 %vm901_vm0, %v900_v1 }
 0x381   : > { %832 = vmatprep.subr.bf16.mxu0 %v900_v1  ;;  %v889_v13 = vpop.eup %888 }
 0x382   : > { %v525_v15 = vmul.f32 %v889_v13, %v881_v56 }
 0x384   : > { %v526_v19 = vpack.c.bf16 %v525_v15, %v525_v15 }
 0x387   : > { %823 = vmatmul.mubr.msk.bf16.vlgmr.msra.gmra.mrb[8].mxu0 %vm240_vm2, %v410_v12 }
 0x388   : > { %834 = vmatprep.mubr.msk.bf16.mxu0 %vm901_vm0, %v900_v1 }
 0x3a3   : > { %v639_v14 = vpop.xlane.xlu1 %638 }
 0x3a4   : > { %890 = vrcp.f32 %v639_v14 }
 0x3a7   : > { %v528_v16 = vpop.permute.xlu1 %527 }
 0x3a8   : > { %v533_v17 = vsel %vm304_vm3, %v528_v16, 0 }
 0x3a9   : > { %833 = vmatpush3.bf16.msra.mxu0 %v533_v17 }
 0x3aa   : > { %844 = vmatprep.subr.bf16.mxu0 %v900_v1 }
 0x3ac   : > { %835 = vmatmul.mubr.msk.bf16.vlgmr.msra.gmra.mrb[12].mxu0 %vm240_vm2, %v526_v19 }
 0x3ad   : > { %845 = vmatpush3.bf16.msra.mxu0 %v649_v20  ;;  %846 = vmatprep.mubr.msk.bf16.mxu0 %vm901_vm0, %v900_v1 }
 0x3ae   : > { %v891_v21 = vpop.eup %890 }
 0x3af   : > { %v641_v22 = vmul.f32 %v891_v21, %v883_v61 }
 0x3b1   : > { %v642_v23 = vpack.c.bf16 %v641_v22, %v641_v22 }
 0x3b4   : > { %847 = vmatmul.mubr.msk.bf16.vlgmr.msra.gmra.mrb[16].mxu0 %vm240_vm2, %v642_v23 }
 0x452   : > { %v342_v24 = vpop.f32.mrb[4].mxu0 }
 0x453   : > { %348 = vst.msk [vmem:[#allocation2] sm:$0xff] %vm240_vm2, %v342_v24  ;;  %v812_v25 = vpop.f32.mrb[5].mxu0 }
 0x454   : > { %v345_v26 = vpop.f32.mrb[6].mxu0 }
 0x455   : > { %v813_v27 = vpop.f32.mrb[7].mxu0 }
 0x45a   : > { %v453_v28 = vpop.f32.mrb[8].mxu0 }
 0x45b   : > { %460 = vrot.lane.b32.xlu1 %v453_v28, %s913_s8  ;;  %v824_v29 = vpop.f32.mrb[9].mxu0 }
 0x45c   : > { %v456_v30 = vpop.f32.mrb[10].mxu0 }
 0x45d   : > { %v825_v31 = vpop.f32.mrb[11].mxu0 }
 0x47f   : > { %v569_v32 = vpop.f32.mrb[12].mxu0 }
 0x480   : > { %576 = vrot.lane.b32.xlu0 %v569_v32, %s914_s9  ;;  %v836_v1 = vpop.f32.mrb[13].mxu0 }
 0x481   : > { %v572_v33 = vpop.f32.mrb[14].mxu0 }
 0x482   : > { %v837_v34 = vpop.f32.mrb[15].mxu0 }
 0x487   : > { %v685_v35 = vpop.f32.mrb[16].mxu0 }
 0x488   : > { %692 = vrot.lane.b32.xlu1 %v685_v35, %s915_s10  ;;  %v848_v36 = vpop.f32.mrb[17].mxu0 }
 0x489   : > { %v688_v37 = vpop.f32.mrb[18].mxu0 }
 0x48a   : > { %v849_v38 = vpop.f32.mrb[19].mxu0 }
 0x4cd   : > { %v461_v39 = vpop.permute.xlu1 %460 }
 0x4ce   : > { %464 = vst.msk [vmem:[#allocation2] sm:$0xff] %vm463_vm4, %v461_v39 }
 0x4f2   : > { %v577_v40 = vpop.permute.xlu0 %576 }
 0x4f3   : > { %580 = vst.msk [vmem:[#allocation2] sm:$0xff] %vm579_vm5, %v577_v40 }
 0x4fa   : > { %v693_v41 = vpop.permute.xlu1 %692 }
 0x4fb   : > { %696 = vst.msk [vmem:[#allocation2] sm:$0xff] %vm695_vm6, %v693_v41 }
 0x502   : > { %v697_v42 = vld [vmem:[#allocation2] sm:$0xff] }
 0x503   : > { %v698_v43 = vpack.c.bf16 %v697_v42, %v697_v42 }
 0x505   : > { %700 = vst.msk [vmem:[%s165_s16] sm:$0xf] %vm699_vm7, %v698_v43 }
 0x506 PF: > { %s13_s12 = sadd.s32 1, %s898_s12  }
 0x507   : > { %p10_p4 = scmp.ge.s32.totalorder %s13_s12, 4  }
 0x509   :  { %12 = sbr.rel (!%p10_p4) target bundleno = 1 (0x1), region = 62 }

</bundles_post_ra>
